<compile_context>
chip_gen: v5e
topology: v5e:2x2
jax: 0.10.0
libtpu: 0.0.40
codegen_flags: <defaults>
</compile_context>

<pallas_src>
import jax
import jax.numpy as jnp
from jax.experimental import pallas as pl
from jax.experimental.pallas import tpu as pltpu


def _logreg_kernel(x_ref, w_ref, b_ref, o_ref):
    # Upcast inside the kernel (free VPU op) so HBM traffic stays at input width.
    x = x_ref[...].astype(jnp.float32)          # (TM, D)
    w = w_ref[...].astype(jnp.float32)          # (1, D), lane-dense; sublane-broadcast is free
    # VPU multiply + XLU lane reduction instead of a width-1 MXU matvec.
    z = jnp.sum(x * w, axis=-1, keepdims=True)  # (TM, 1)
    z = z + b_ref[0, 0]                         # scalar bias from SMEM (scalar path, no vld)
    # exp + reciprocal go to the EUP slot.
    o_ref[...] = jax.nn.sigmoid(z).astype(o_ref.dtype)


def _choose_tile_m(n, d, itemsize):
    # Target ~4 MiB per x buffer; the pipeline double-buffers it (~8 MiB total),
    # comfortably inside v5e's 16 MiB scoped-VMEM default and v7x's 64 MiB VMEM.
    target_bytes = 4 * 1024 * 1024
    tm = target_bytes // max(1, d * itemsize)
    tm = max(8, min(2048, tm))
    tm = (tm // 8) * 8                 # second-to-last block dim must be a multiple of 8
    if n <= tm:
        return n                       # single full-extent block is always legal
    return tm


def regressao_logistica_forward(x, weight, bias, *, tile_m=None):
    """x: (N, D), weight: (1, D), bias: (1,)  ->  sigmoid(x @ weight.T + bias): (N, 1)."""
    n, d = x.shape
    if tile_m is None:
        tile_m = _choose_tile_m(n, d, x.dtype.itemsize)
    tile_m = int(tile_m)

    w_row = weight.reshape(1, d)                      # keep lane-dense (1, D), no transpose
    b_smem = bias.reshape(1, 1).astype(jnp.float32)   # scalar -> SMEM

    return pl.pallas_call(
        _logreg_kernel,
        out_shape=jax.ShapeDtypeStruct((n, 1), x.dtype),
        grid=(pl.cdiv(n, tile_m),),
        in_specs=[
            pl.BlockSpec((tile_m, d), lambda i: (i, 0)),             # x: tiled over batch
            pl.BlockSpec((1, d), lambda i: (0, 0)),                  # weight: resident row
            pl.BlockSpec(memory_space=pltpu.MemorySpace.SMEM),       # bias: SMEM scalar
        ],
        out_specs=pl.BlockSpec((tile_m, 1), lambda i: (i, 0)),
        compiler_params=pltpu.CompilerParams(
            dimension_semantics=("parallel",),
        ),
    )(x, w_row, b_smem)


if __name__ == "__main__":
    key = jax.random.PRNGKey(0)
    k_x, k_w, k_b, k_x2 = jax.random.split(key, 4)

    # --- Small shapes consistent with RegressaoLogistica(n_input, 1) ---
    batch, n_input = 8, 4
    x = jax.random.normal(k_x, (batch, n_input), dtype=jnp.float32)

    # Deterministic init mimicking nn.Linear's U(-1/sqrt(fan_in), 1/sqrt(fan_in)).
    bound = 1.0 / jnp.sqrt(jnp.float32(n_input))
    weight = jax.random.uniform(k_w, (1, n_input), minval=-bound, maxval=bound,
                                dtype=jnp.float32)
    bias = jax.random.uniform(k_b, (1,), minval=-bound, maxval=bound,
                              dtype=jnp.float32)

    y_hat = regressao_logistica_forward(x, weight, bias)
    jax.block_until_ready(y_hat)

    ref = jax.nn.sigmoid(x @ weight.T + bias)
    assert y_hat.shape == (batch, 1)
    assert jnp.allclose(y_hat, ref, atol=1e-5, rtol=1e-5)

    # --- Exercise the tiled / pipelined path (grid > 1, ragged last tile) ---
    batch2, n_input2 = 300, 16
    x2 = jax.random.normal(k_x2, (batch2, n_input2), dtype=jnp.float32)
    bound2 = 1.0 / jnp.sqrt(jnp.float32(n_input2))
    weight2 = jax.random.uniform(k_w, (1, n_input2), minval=-bound2, maxval=bound2,
                                 dtype=jnp.float32)
    bias2 = jax.random.uniform(k_b, (1,), minval=-bound2, maxval=bound2,
                               dtype=jnp.float32)

    y2 = regressao_logistica_forward(x2, weight2, bias2, tile_m=128)
    jax.block_until_ready(y2)

    ref2 = jax.nn.sigmoid(x2 @ weight2.T + bias2)
    assert y2.shape == (batch2, 1)
    assert jnp.allclose(y2, ref2, atol=1e-5, rtol=1e-5)

    print("KERNEL_OK")
</pallas_src>

<mosaic_0001>
module attributes {stable_mosaic.version = 11 : i64} {
  func.func @_logreg_kernel(%arg0: i32, %arg1: memref<8x4xf32, #tpu.memory_space<vmem>>, %arg2: memref<1x4xf32, #tpu.memory_space<vmem>>, %arg3: memref<1x1xf32, #tpu.memory_space<smem>>, %arg4: memref<8x1xf32, #tpu.memory_space<vmem>>) attributes {dimension_semantics = [#tpu.dimension_semantics<parallel>], iteration_bounds = array<i64: 1>, scalar_prefetch = 0 : i64, scratch_operands = 0 : i64, tpu.core_type = #tpu.core_type<tc>, window_params = [{transform_indices = @transform_0, window_bounds = array<i64: 8, 4>}, {pipeline_mode = #tpu.pipeline_mode<synchronous>, transform_indices = @transform_1, window_bounds = array<i64: 1, 4>}, {transform_indices = @transform_2, window_bounds = array<i64: 1, 1>}, {transform_indices = @transform_3, window_bounds = array<i64: 8, 1>}]} {
    %c0 = arith.constant 0 : index
    %c0_0 = arith.constant 0 : index
    %0 = vector.load %arg1[%c0, %c0_0] : memref<8x4xf32, #tpu.memory_space<vmem>>, vector<8x4xf32>
    %c0_1 = arith.constant 0 : index
    %c0_2 = arith.constant 0 : index
    %1 = vector.load %arg2[%c0_1, %c0_2] : memref<1x4xf32, #tpu.memory_space<vmem>>, vector<1x4xf32>
    %2 = vector.broadcast %1 : vector<1x4xf32> to vector<8x4xf32>
    %3 = arith.mulf %0, %2 : vector<8x4xf32>
    %cst = arith.constant dense<0.000000e+00> : vector<8xf32>
    %4 = vector.multi_reduction <add>, %3, %cst [1] : vector<8x4xf32> to vector<8xf32>
    %5 = vector.shape_cast %4 : vector<8xf32> to vector<8x1xf32>
    %c0_3 = arith.constant 0 : index
    %c0_4 = arith.constant 0 : index
    %6 = memref.load %arg3[%c0_3, %c0_4] : memref<1x1xf32, #tpu.memory_space<smem>>
    %7 = vector.broadcast %6 : f32 to vector<8x1xf32>
    %8 = arith.addf %5, %7 : vector<8x1xf32>
    %9 = arith.negf %8 : vector<8x1xf32>
    %10 = math.exp %9 : vector<8x1xf32>
    %cst_5 = arith.constant 1.000000e+00 : f32
    %11 = vector.broadcast %cst_5 : f32 to vector<8x1xf32>
    %12 = arith.addf %11, %10 : vector<8x1xf32>
    %13 = arith.divf %11, %12 : vector<8x1xf32>
    %c0_6 = arith.constant 0 : index
    %c0_7 = arith.constant 0 : index
    %14 = vector.load %arg4[%c0_6, %c0_7] : memref<8x1xf32, #tpu.memory_space<vmem>>, vector<8x1xf32>
    tpu.vector_store %arg4[%c0_6, %c0_7], %13 {strides = array<i32>} : memref<8x1xf32, #tpu.memory_space<vmem>>, vector<8x1xf32>,
    return
  }
  func.func @transform_0(%arg0: i32) -> (i32, i32) {
    %c0_i32 = arith.constant 0 : i32
    %c0_i32_0 = arith.constant 0 : i32
    return %arg0, %c0_i32 : i32, i32
  }
  func.func @transform_1(%arg0: i32) -> (i32, i32) {
    %c0_i32 = arith.constant 0 : i32
    %c0_i32_0 = arith.constant 0 : i32
    %c0_i32_1 = arith.constant 0 : i32
    return %c0_i32, %c0_i32_0 : i32, i32
  }
  func.func @transform_2(%arg0: i32) -> (i32, i32) {
    %c0_i32 = arith.constant 0 : i32
    %c0_i32_0 = arith.constant 0 : i32
    %c0_i32_1 = arith.constant 0 : i32
    return %c0_i32, %c0_i32_0 : i32, i32
  }
  func.func @transform_3(%arg0: i32) -> (i32, i32) {
    %c0_i32 = arith.constant 0 : i32
    %c0_i32_0 = arith.constant 0 : i32
    return %arg0, %c0_i32 : i32, i32
  }
}

</mosaic_0001>

<bundles_post_ra>
// kernel: tpu_custom_call.1
= control target key start
LH: loop header
LB: loop body
LE: loop exit
PB: predicated region body
PF: predicated region fallthrough
CT: control target
= control target key end

     0   :  { %vm21_vm0 = vcmask 31744   ;;  %vm47_vm4 = vcmask 7168   ;;  %s91_s0 = inlined_call_operand.vmem [shape: f32[8,4], index: 0, kind: input, shape index: {}]   ;;  %s92_s1 = inlined_call_operand.vmem [shape: f32[1,4], index: 1, kind: input, shape index: {}]   ;;  %s93_s2 = inlined_call_operand.<no memory space> [shape: f32[1,1], index: 2, kind: input, shape index: {}]   ;;  %s94_s3 = inlined_call_operand.vmem [shape: f32[8,1], index: 3, kind: output, shape index: {}]  }
   0x1   :  { %v15_v0 = vld [vmem:[%s91_s0] sm:$0xff]  ;;  %v26_v4 = vstv %s93_s2 }
   0x2   :  { %v54_v1 = vld [vmem:[%s92_s1] ss:$0 sm:$0xff] }
   0x3   :  { %v20_v2 = vmul.f32 %v54_v1, %v15_v0 }
   0x5   :  { %v22_v3 = vsel %vm21_vm0, %v20_v2, 0.0 }
   0x6   :  { %23 = vadd.xlane.f32.xlu0 %v22_v3 }
  0x79   :  { %v24_v5 = vpop.xlane.xlu0 %23 }
  0x7a   :  { %v27_v6 = vadd.f32 %v26_v4, %v24_v5 }
  0x7c   :  { %v53_v7 = vmul.f32 -1.442695, %v27_v6 }
  0x7e   :  { %55 = vpow2.f32 %v53_v7 }
  0x84   :  { %v56_v8 = vpop.eup %55 }
  0x85   :  { %v31_v9 = vadd.f32 1.0, %v56_v8 }
  0x87   :  { %57 = vrcp.f32 %v31_v9  ;;  %v43_v13 = vand.u32 2147483648, %v31_v9  ;;  %v41_v15 = vand.u32 2147483647, %v31_v9  ;;  %vm37_vm2 = vweird.f32 %v31_v9 }
  0x89   :  { %v44_v17 = vor.u32 1.1754944e-38, %v43_v13  ;;  %vm42_vm5 = vcmp.eq.f32.partialorder %v41_v15, 8.507059e+37 }
  0x8d   :  { %v58_v10 = vpop.eup %57 }
  0x8e   :  { %v33_v11 = vmul.f32 %v58_v10, %v31_v9  ;;  %vm38_vm1 = vweird.f32 %v58_v10 }
  0x8f   :  { %vm39_vm3 = vmor %vm37_vm2, %vm38_vm1 }
  0x90   :  { %v34_v12 = vsub.f32 1.0, %v33_v11 }
  0x92   :  { %v35_v14 = vmul.f32 %v58_v10, %v34_v12 }
  0x94   :  { %v36_v16 = vadd.f32 %v58_v10, %v35_v14 }
  0x96   :  { %v40_v18 = vsel %vm39_vm3, %v58_v10, %v36_v16 }
  0x97   :  { %v45_v19 = vsel %vm42_vm5, %v44_v17, %v40_v18 }
  0x98   :  { %48 = vst.msk [vmem:[%s94_s3] sm:$0xff] %vm47_vm4, %v45_v19 }

</bundles_post_ra>
